<compile_context>
chip_gen: v6e
topology: v6e:2x2x1
jax: 0.10.0
libtpu: 0.0.40
codegen_flags: <defaults>
</compile_context>

<pallas_src>
import functools
import math

import jax
import jax.numpy as jnp
from jax.experimental import pallas as pl
from jax.experimental.pallas import tpu as pltpu

_LANE = 128


def _bce_reduce_kernel(x_ref, t_ref, out_ref, acc_ref, *,
                       rows, block_rows, steps_per_core, exact):
    """Per-lane partial sums, accumulated over the (core, step) grid.

    acc rows: 0 -> sum(bce)    over all elements seen
              1 -> sum(bce*t)  (== sum of bce over target==1 elements)
              2 -> sum(t)      (== count of target==1 elements)
    """
    c = pl.program_id(0)
    i = pl.program_id(1)

    @pl.when(i == 0)
    def _():
        acc_ref[...] = jnp.zeros_like(acc_ref)

    x = x_ref[...].astype(jnp.float32)
    t = t_ref[...].astype(jnp.float32)

    # Numerically-stable binary cross entropy with logits (VPU + EUP only).
    bce = jnp.maximum(x, 0.0) - x * t + jnp.log1p(jnp.exp(-jnp.abs(x)))
    bce1 = bce * t                          # valid because t in {0, 1}

    def accumulate(b, b1, tt):
        acc_ref[0:1, :] += jnp.sum(b,  axis=0, keepdims=True)
        acc_ref[1:2, :] += jnp.sum(b1, axis=0, keepdims=True)
        acc_ref[2:3, :] += jnp.sum(tt, axis=0, keepdims=True)

    if exact:
        # Grid tiles the input exactly: no masking anywhere.
        accumulate(bce, bce1, t)
    else:
        blk = c * steps_per_core + i        # logical block index
        row0 = blk * block_rows
        is_full = row0 + block_rows <= rows

        @pl.when(is_full)
        def _():
            accumulate(bce, bce1, t)

        @pl.when(jnp.logical_not(is_full))
        def _():
            # Boundary (partial) block or over-allocated duplicate block
            # (nvalid <= 0 -> fully masked).  Row-level compare only; use
            # jnp.where so garbage/NaN in padded rows can't leak into sums.
            nvalid = rows - row0
            r = jax.lax.broadcasted_iota(jnp.int32, bce.shape, 0)
            v = r < nvalid
            accumulate(jnp.where(v, bce, 0.0),
                       jnp.where(v, bce1, 0.0),
                       jnp.where(v, t, 0.0))

    @pl.when(i == pl.num_programs(1) - 1)
    def _():
        out_ref[0] = acc_ref[...]


def bce_with_logits_loss_weighted(x, target, weighted=False, *,
                                  block_rows=2048, num_cores=2):
    """x, target: [N, H, W]; x float logits, target {0,1} (any dtype).

    Returns the scalar f32 loss matching BCEWithLogitsLossWeighted.forward.
    """
    assert x.shape == target.shape
    total = int(x.size)
    lane = _LANE

    # Lane-dense flatten: (N,H,W) -> (rows, 128). Row-major reshape is free.
    xf = x.reshape(-1)
    tf = target.reshape(-1)
    rows = -(-total // lane)
    pad = rows * lane - total
    if pad:
        # TODO(synk): this copy (one extra HBM read+write per tensor) only
        # fires when N*H*W % 128 != 0.  A copy-free "aligned prefix" slice is
        # not possible in XLA either (slices materialize), and flat 1-D blocks
        # would force an inefficient vector layout.  The padded (x=0, t=0)
        # elements are corrected analytically below, so the kernel never has
        # to mask them.
        xf = jnp.pad(xf, (0, pad))
        tf = jnp.pad(tf, (0, pad))
    x2 = xf.reshape(rows, lane)
    t2 = tf.reshape(rows, lane)

    # Block sizing: as large as the cap allows (amortize ~0.35us/grid-step),
    # but scale down so each of `num_cores` TensorCores gets >= 2 steps when
    # the input permits (keeps both v7x cores and their HBM bandwidth busy).
    cap = max(8, (int(block_rows) // 8) * 8)
    want = -(-rows // (num_cores * 2))
    br = min(cap, ((want + 7) // 8) * 8)
    if br >= rows:
        br = rows                            # single full-extent block (legal)
    steps_total = -(-rows // br)
    ncores = num_cores if steps_total >= num_cores else 1
    steps_per_core = -(-steps_total // ncores)
    exact = (rows % br == 0) and (ncores * steps_per_core == steps_total)

    if ncores * steps_per_core == steps_total:
        def in_map(c, i):
            return (c * steps_per_core + i, 0)
    else:
        max_blk = steps_total - 1

        def in_map(c, i):
            # Over-allocated steps re-read the last real block; their
            # contribution is zeroed by the in-kernel row mask.
            return (jnp.minimum(c * steps_per_core + i, max_blk), 0)

    in_spec = pl.BlockSpec((br, lane), in_map)

    kernel = functools.partial(
        _bce_reduce_kernel, rows=rows, block_rows=br,
        steps_per_core=steps_per_core, exact=exact)

    partials = pl.pallas_call(
        kernel,
        out_shape=jax.ShapeDtypeStruct((ncores, 3, lane), jnp.float32),
        grid_spec=pltpu.PrefetchScalarGridSpec(
            num_scalar_prefetch=0,
            grid=(ncores, steps_per_core),
            in_specs=[in_spec, in_spec],
            out_specs=pl.BlockSpec((1, 3, lane), lambda c, i: (c, 0, 0)),
            scratch_shapes=[pltpu.VMEM((3, lane), jnp.float32)],
        ),
        compiler_params=pltpu.CompilerParams(
            dimension_semantics=("parallel", "arbitrary"),
            vmem_limit_bytes=32 * 1024 * 1024),
    )(x2, t2)

    sums = jnp.sum(partials, axis=(0, 2))        # (3,)
    s_all, s1, c1 = sums[0], sums[1], sums[2]
    if pad:
        # Each zero-padded element (x=0, t=0) contributed exactly log(2).
        s_all = s_all - jnp.float32(pad * math.log(2.0))
    tot_f = jnp.float32(total)
    s0 = s_all - s1
    c0 = tot_f - c1

    if weighted:
        # TODO(synk): torch.unique supports arbitrary label values; per the
        # module's docstring target is binary {0,1}, so only the two classes
        # are handled here.
        num = jnp.where(c1 > 0, s1 / c1, 0.0) + jnp.where(c0 > 0, s0 / c0, 0.0)
        den = jnp.where(c1 > 0, 1.0, 0.0) + jnp.where(c0 > 0, 1.0, 0.0)
        return num / den
    return s_all / tot_f


def _reference_loss(x, t, weighted):
    x = x.astype(jnp.float32)
    t = t.astype(jnp.float32)
    bce = jnp.maximum(x, 0.0) - x * t + jnp.log1p(jnp.exp(-jnp.abs(x)))
    if weighted:
        n1 = jnp.sum(t > 0.5).astype(jnp.float32)
        n0 = jnp.sum(t <= 0.5).astype(jnp.float32)
        w = jnp.where(t > 0.5, 1.0 / n1, 1.0 / n0)
    else:
        w = jnp.ones_like(t)
    return jnp.sum(bce * w) / jnp.sum(w)


if __name__ == "__main__":
    k0, k1, k2, k3, k4, k5 = jax.random.split(jax.random.PRNGKey(0), 6)

    # 1) Primary shape [N, H, W] = [2, 16, 16] (512 elements, lane-aligned):
    #    exercises the mask-free "exact" path with a single full-extent block.
    N, H, W = 2, 16, 16
    x = jax.random.normal(k0, (N, H, W), dtype=jnp.float32)
    target = jax.random.bernoulli(k1, 0.3, (N, H, W)).astype(jnp.float32)

    loss_u = jax.block_until_ready(
        bce_with_logits_loss_weighted(x, target, weighted=False))
    loss_w = jax.block_until_ready(
        bce_with_logits_loss_weighted(x, target, weighted=True))
    ref_u = _reference_loss(x, target, weighted=False)
    ref_w = _reference_loss(x, target, weighted=True)
    assert jnp.allclose(loss_u, ref_u, atol=1e-4, rtol=1e-4), (loss_u, ref_u)
    assert jnp.allclose(loss_w, ref_w, atol=1e-4, rtol=1e-4), (loss_w, ref_w)

    # 2) Misaligned shape + narrow target dtype: exercises the analytic tail
    #    correction, the boundary-block row mask and the 2-way core split.
    N2, H2, W2 = 2, 37, 16
    x_odd = jax.random.normal(k2, (N2, H2, W2), dtype=jnp.float32)
    t_odd = jax.random.bernoulli(k3, 0.3, (N2, H2, W2)).astype(jnp.bfloat16)
    loss_odd = jax.block_until_ready(
        bce_with_logits_loss_weighted(x_odd, t_odd, weighted=True, block_rows=8))
    ref_odd = _reference_loss(x_odd, t_odd, weighted=True)
    assert jnp.allclose(loss_odd, ref_odd, atol=1e-4, rtol=1e-4), (loss_odd, ref_odd)

    # 3) Odd number of blocks across 2 cores: exercises the clamped index_map
    #    plus the fully-masked over-allocated duplicate block.
    N3, H3, W3 = 2, 12, 128
    x_3 = jax.random.normal(k4, (N3, H3, W3), dtype=jnp.float32)
    t_3 = jax.random.bernoulli(k5, 0.3, (N3, H3, W3)).astype(jnp.float32)
    loss_3 = jax.block_until_ready(
        bce_with_logits_loss_weighted(x_3, t_3, weighted=True, block_rows=8))
    ref_3 = _reference_loss(x_3, t_3, weighted=True)
    assert jnp.allclose(loss_3, ref_3, atol=1e-4, rtol=1e-4), (loss_3, ref_3)

    print("KERNEL_OK")
</pallas_src>

<mosaic_0001>
module attributes {stable_mosaic.version = 11 : i64} {
  func.func @_bce_reduce_kernel(%arg0: i32, %arg1: i32, %arg2: memref<4x128xf32, #tpu.memory_space<vmem>>, %arg3: memref<4x128xf32, #tpu.memory_space<vmem>>, %arg4: memref<1x3x128xf32, #tpu.memory_space<vmem>>, %arg5: memref<3x128xf32, #tpu.memory_space<vmem>>) attributes {dimension_semantics = [#tpu.dimension_semantics<parallel>, #tpu.dimension_semantics<arbitrary>], iteration_bounds = array<i64: 1, 1>, scalar_prefetch = 0 : i64, scratch_operands = 1 : i64, tpu.core_type = #tpu.core_type<tc>, window_params = [{transform_indices = @transform_0, window_bounds = array<i64: 4, 128>}, {transform_indices = @transform_1, window_bounds = array<i64: 4, 128>}, {transform_indices = @transform_2, window_bounds = array<i64: 1, 3, 128>}]} {
    %c0_i32 = arith.constant 0 : i32
    %0 = arith.cmpi eq, %arg1, %c0_i32 : i32
    %1 = arith.extui %0 : i1 to i32
    %c0_i32_0 = arith.constant 0 : i32
    %2 = arith.cmpi ne, %1, %c0_i32_0 : i32
    scf.if %2 {
      %cst_20 = arith.constant 0.000000e+00 : f32
      %34 = vector.broadcast %cst_20 : f32 to vector<3x128xf32>
      %c0_21 = arith.constant 0 : index
      %c0_22 = arith.constant 0 : index
      %35 = vector.load %arg5[%c0_21, %c0_22] : memref<3x128xf32, #tpu.memory_space<vmem>>, vector<3x128xf32>
      tpu.vector_store %arg5[%c0_21, %c0_22], %34 {strides = array<i32>} : memref<3x128xf32, #tpu.memory_space<vmem>>, vector<3x128xf32>,
    } else {
    }
    %c0 = arith.constant 0 : index
    %c0_1 = arith.constant 0 : index
    %3 = vector.load %arg2[%c0, %c0_1] : memref<4x128xf32, #tpu.memory_space<vmem>>, vector<4x128xf32>
    %c0_2 = arith.constant 0 : index
    %c0_3 = arith.constant 0 : index
    %4 = vector.load %arg3[%c0_2, %c0_3] : memref<4x128xf32, #tpu.memory_space<vmem>>, vector<4x128xf32>
    %cst = arith.constant 0.000000e+00 : f32
    %5 = vector.broadcast %cst : f32 to vector<4x128xf32>
    %6 = arith.maximumf %3, %5 : vector<4x128xf32>
    %7 = arith.mulf %3, %4 : vector<4x128xf32>
    %8 = arith.subf %6, %7 : vector<4x128xf32>
    %9 = math.absf %3 : vector<4x128xf32>
    %cst_4 = arith.constant 0.000000e+00 : f32
    %10 = vector.broadcast %cst_4 : f32 to vector<4x128xf32>
    %11 = arith.subf %10, %9 : vector<4x128xf32>
    %12 = math.exp %11 : vector<4x128xf32>
    %13 = math.log1p %12 : vector<4x128xf32>
    %14 = arith.addf %8, %13 : vector<4x128xf32>
    %15 = arith.mulf %14, %4 : vector<4x128xf32>
    %c0_5 = arith.constant 0 : index
    %c0_6 = arith.constant 0 : index
    %16 = vector.load %arg5[%c0_5, %c0_6] : memref<3x128xf32, #tpu.memory_space<vmem>>, vector<1x128xf32>
    %cst_7 = arith.constant dense<0.000000e+00> : vector<128xf32>
    %17 = vector.multi_reduction <add>, %14, %cst_7 [0] : vector<4x128xf32> to vector<128xf32>
    %18 = vector.shape_cast %17 : vector<128xf32> to vector<1x128xf32>
    %19 = arith.addf %16, %18 : vector<1x128xf32>
    %c0_8 = arith.constant 0 : index
    %c0_9 = arith.constant 0 : index
    %20 = vector.load %arg5[%c0_8, %c0_9] : memref<3x128xf32, #tpu.memory_space<vmem>>, vector<1x128xf32>
    tpu.vector_store %arg5[%c0_8, %c0_9], %19 {strides = array<i32>} : memref<3x128xf32, #tpu.memory_space<vmem>>, vector<1x128xf32>,
    %c1 = arith.constant 1 : index
    %c0_10 = arith.constant 0 : index
    %21 = vector.load %arg5[%c1, %c0_10] : memref<3x128xf32, #tpu.memory_space<vmem>>, vector<1x128xf32>
    %cst_11 = arith.constant dense<0.000000e+00> : vector<128xf32>
    %22 = vector.multi_reduction <add>, %15, %cst_11 [0] : vector<4x128xf32> to vector<128xf32>
    %23 = vector.shape_cast %22 : vector<128xf32> to vector<1x128xf32>
    %24 = arith.addf %21, %23 : vector<1x128xf32>
    %c1_12 = arith.constant 1 : index
    %c0_13 = arith.constant 0 : index
    %25 = vector.load %arg5[%c1_12, %c0_13] : memref<3x128xf32, #tpu.memory_space<vmem>>, vector<1x128xf32>
    tpu.vector_store %arg5[%c1_12, %c0_13], %24 {strides = array<i32>} : memref<3x128xf32, #tpu.memory_space<vmem>>, vector<1x128xf32>,
    %c2 = arith.constant 2 : index
    %c0_14 = arith.constant 0 : index
    %26 = vector.load %arg5[%c2, %c0_14] : memref<3x128xf32, #tpu.memory_space<vmem>>, vector<1x128xf32>
    %cst_15 = arith.constant dense<0.000000e+00> : vector<128xf32>
    %27 = vector.multi_reduction <add>, %4, %cst_15 [0] : vector<4x128xf32> to vector<128xf32>
    %28 = vector.shape_cast %27 : vector<128xf32> to vector<1x128xf32>
    %29 = arith.addf %26, %28 : vector<1x128xf32>
    %c2_16 = arith.constant 2 : index
    %c0_17 = arith.constant 0 : index
    %30 = vector.load %arg5[%c2_16, %c0_17] : memref<3x128xf32, #tpu.memory_space<vmem>>, vector<1x128xf32>
    tpu.vector_store %arg5[%c2_16, %c0_17], %29 {strides = array<i32>} : memref<3x128xf32, #tpu.memory_space<vmem>>, vector<1x128xf32>,
    %c0_i32_18 = arith.constant 0 : i32
    %31 = arith.cmpi eq, %arg1, %c0_i32_18 : i32
    %32 = arith.extui %31 : i1 to i32
    %c0_i32_19 = arith.constant 0 : i32
    %33 = arith.cmpi ne, %32, %c0_i32_19 : i32
    scf.if %33 {
      %c0_20 = arith.constant 0 : index
      %c0_21 = arith.constant 0 : index
      %34 = vector.load %arg5[%c0_20, %c0_21] : memref<3x128xf32, #tpu.memory_space<vmem>>, vector<3x128xf32>
      %c0_22 = arith.constant 0 : index
      %c0_23 = arith.constant 0 : index
      %c0_24 = arith.constant 0 : index
      %35 = vector.load %arg4[%c0_22, %c0_23, %c0_24] : memref<1x3x128xf32, #tpu.memory_space<vmem>>, vector<1x3x128xf32>
      %36 = vector.shape_cast %35 : vector<1x3x128xf32> to vector<3x128xf32>
      %37 = vector.shape_cast %34 : vector<3x128xf32> to vector<1x3x128xf32>
      tpu.vector_store %arg4[%c0_22, %c0_23, %c0_24], %37 {strides = array<i32>} : memref<1x3x128xf32, #tpu.memory_space<vmem>>, vector<1x3x128xf32>,
    } else {
    }
    return
  }
  func.func @transform_0(%arg0: i32, %arg1: i32) -> (i32, i32) {
    %c1_i32 = arith.constant 1 : i32
    %0 = arith.muli %arg0, %c1_i32 : i32
    %1 = arith.addi %0, %arg1 : i32
    %c0_i32 = arith.constant 0 : i32
    %c0_i32_0 = arith.constant 0 : i32
    return %1, %c0_i32 : i32, i32
  }
  func.func @transform_1(%arg0: i32, %arg1: i32) -> (i32, i32) {
    %c1_i32 = arith.constant 1 : i32
    %0 = arith.muli %arg0, %c1_i32 : i32
    %1 = arith.addi %0, %arg1 : i32
    %c0_i32 = arith.constant 0 : i32
    %c0_i32_0 = arith.constant 0 : i32
    return %1, %c0_i32 : i32, i32
  }
  func.func @transform_2(%arg0: i32, %arg1: i32) -> (i32, i32, i32) {
    %c0_i32 = arith.constant 0 : i32
    %c0_i32_0 = arith.constant 0 : i32
    %c0_i32_1 = arith.constant 0 : i32
    return %arg0, %c0_i32, %c0_i32_0 : i32, i32, i32
  }
}

</mosaic_0001>

<bundles_post_ra>
// kernel: tpu_custom_call.1
= control target key start
LH: loop header
LB: loop body
LE: loop exit
PB: predicated region body
PF: predicated region fallthrough
CT: control target
= control target key end

     0   :  { %7 = vsyncpa [#allocation4], 0  ;;  %s191_s0 = inlined_call_operand.hbm [shape: f32[4,128], index: 0, kind: input, shape index: {}]   ;;  %s192_s1 = inlined_call_operand.hbm [shape: f32[4,128], index: 1, kind: input, shape index: {}]   ;;  %s193_s2 = inlined_call_operand.vmem [shape: f32[1,3,128], index: 2, kind: output, shape index: {}]  }
   0x1   :  { %8 = vsyncpa [#allocation6], 0  ;;  %s161_s9 = smov [#allocation3]   ;;  %s162_s11 = smov [#allocation5]  }
   0x2   :  { %s18_s10 = sshll.u32 %s161_s9, 4  ;;  %s31_s12 = sshll.u32 %s162_s11, 4  ;;  %s19_s10 = int_to_ptr.vmem [resolvable:$true] %s18_s10  ;;  %s32_s12 = int_to_ptr.vmem [resolvable:$true] %s31_s12 }
   0x3   :  { %s125_s13 = scalar_lea.vmem %s19_s10, 64  ;;  %p130_p1 = scmp.lt.s32.totalorder %s19_s10, %s19_s10 }
   0x4   :  { %p126_p0 = scmp.ne.s32.totalorder %s19_s10, %s125_s13  ;;  %p131_p2 = scmp.lt.s32.totalorder %s125_s13, %s125_s13 }
   0x6   :  { %p132_p3 = por %p131_p2, %p130_p1 }
   0x8   :  { %p133_p4 = pnand %p132_p3, %p126_p0 }
   0xa   :  { %136 = shalt.err (!%p133_p4)
}
   0xb   :  { %21 = dma.hbm_to_vmem [thread:$0]  %s191_s0, 64, %s19_s10, [#allocation4]  }
   0xc   :  { %s145_s16 = scalar_lea.vmem %s32_s12, 64  ;;  %p150_p6 = scmp.lt.s32.totalorder %s32_s12, %s32_s12 }
   0xd   :  { %p146_p5 = scmp.ne.s32.totalorder %s32_s12, %s145_s16  ;;  %p151_p7 = scmp.lt.s32.totalorder %s145_s16, %s145_s16 }
   0xf   :  { %p152_p8 = por %p151_p7, %p150_p6 }
  0x11   :  { %p153_p9 = pnand %p152_p8, %p146_p5 }
  0x13   :  { %156 = shalt.err (!%p153_p9)
}
  0x14   :  { %34 = dma.hbm_to_vmem [thread:$0]  %s192_s1, 64, %s32_s12, [#allocation6]  }
  0x15   :  { %157 = dma.done.wait [#allocation4], 64  }
  0x16   :  { %158 = vsyncadd [#allocation4], 4294967232 }
  0x17   :  { %159 = dma.done.wait [#allocation6], 64  }
  0x18   :  { %160 = vsyncadd [#allocation6], 4294967232  ;;  %v163_v0 = vmov 0.0   ;;  %vm69_vm0 = vcmask 1043456   ;;  %v48_v1 = vld [vmem:[#allocation3] sm:$0xf] }
  0x19   :  { %47 = vst [vmem:[#allocation2] sm:$0x7] %v163_v0  ;;  %v49_v2 = vld [vmem:[#allocation5] sm:$0xf]  ;;  %v53_v3 = vand.u32 2147483647, %v48_v1 }
  0x1a   :  { %v90_v4 = vsel %vm69_vm0, %v49_v2, 0.0  ;;  %v50_v19 = vmax.f32 %v48_v1, 0.0  ;;  %v51_v20 = vmul.f32 %v49_v2, %v48_v1 }
  0x1b   :  { %v91_v5 = vrot.slane %v90_v4, 4  ;;  %v54_v6 = vsub.f32 0.0, %v53_v3 }
  0x1c   :  { %v52_v24 = vsub.f32 %v50_v19, %v51_v20 }
  0x1d   :  { %v92_v7 = vadd.f32 %v91_v5, %v90_v4  ;;  %v55_v8 = vmul.f32 1.442695, %v54_v6 }
  0x1f   :  { %v93_v9 = vrot.slane %v92_v7, 2  ;;  %113 = vpow2.f32 %v55_v8 }
  0x20   :  { %v89_v12 = vld [vmem:[#allocation2 + $0x2] sm:$0x1]  ;;  %v68_v40 = vld [vmem:[#allocation2] sm:$0x1]  ;;  %v79_v43 = vld [vmem:[#allocation2 + $0x1] sm:$0x1] }
  0x21   :  { %v94_v10 = vadd.f32 %v93_v9, %v92_v7 }
  0x23   :  { %v95_v11 = vrot.slane %v94_v10, 1 }
  0x25   :  { %v96_v13 = vadd.f32 %v95_v11, %v94_v10 }
  0x27   :  { %v97_v14 = vadd.f32 %v96_v13, %v89_v12 }
  0x29   :  { %98 = vst [vmem:[#allocation2 + $0x2] sm:$0x1] %v97_v14 }
  0x2c   :  { %v114_v15 = vpop.eup %113 }
  0x2d   :  { %v57_v16 = vadd.f32 1.0, %v114_v15  ;;  %v60_v17 = vmul.f32 -0.5, %v114_v15  ;;  %v63_v21 = vand.u32 2147483647, %v114_v15 }
  0x2f   :  { %115 = vlog2.f32 %v57_v16  ;;  %v61_v18 = vadd.f32 1.0, %v60_v17  ;;  %vm64_vm1 = vcmp.lt.f32.partialorder %v63_v21, 0.0004427343 }
  0x31   :  { %v62_v22 = vmul.f32 %v114_v15, %v61_v18 }
  0x3c   :  { %v116_v23 = vpop.eup %115 }
  0x3d   :  { %v59_v25 = vmul.f32 0.6931472, %v116_v23 }
  0x3f   :  { %v65_v26 = vsel %vm64_vm1, %v62_v22, %v59_v25 }
  0x40   :  { %v66_v27 = vadd.f32 %v65_v26, %v52_v24 }
  0x42   :  { %v70_v28 = vsel %vm69_vm0, %v66_v27, 0.0  ;;  %v67_v29 = vmul.f32 %v66_v27, %v49_v2 }
  0x43   :  { %v71_v30 = vrot.slane %v70_v28, 4 }
  0x44   :  { %v80_v31 = vsel %vm69_vm0, %v67_v29, 0.0 }
  0x45   :  { %v72_v32 = vadd.f32 %v71_v30, %v70_v28  ;;  %v81_v33 = vrot.slane %v80_v31, 4 }
  0x47   :  { %v73_v34 = vrot.slane %v72_v32, 2  ;;  %v82_v35 = vadd.f32 %v81_v33, %v80_v31 }
  0x49   :  { %v74_v36 = vadd.f32 %v73_v34, %v72_v32  ;;  %v83_v37 = vrot.slane %v82_v35, 2 }
  0x4b   :  { %v75_v38 = vrot.slane %v74_v36, 1  ;;  %v84_v39 = vadd.f32 %v83_v37, %v82_v35 }
  0x4d   :  { %v76_v41 = vadd.f32 %v75_v38, %v74_v36  ;;  %v85_v42 = vrot.slane %v84_v39, 1 }
  0x4f   :  { %v77_v44 = vadd.f32 %v76_v41, %v68_v40  ;;  %v86_v45 = vadd.f32 %v85_v42, %v84_v39 }
  0x51   :  { %78 = vst [vmem:[#allocation2] sm:$0x1] %v77_v44  ;;  %v87_v46 = vadd.f32 %v86_v45, %v79_v43 }
  0x53   :  { %88 = vst [vmem:[#allocation2 + $0x1] sm:$0x1] %v87_v46 }
  0x5a   :  { %v102_v47 = vld [vmem:[#allocation2] sm:$0x7] }
  0x5b   :  { %103 = vst [vmem:[%s193_s2] sm:$0x7] %v102_v47 }
  0x5c   :  { %108 = vsyncpa [#allocation4], 1 }
  0x5d   :  { %109 = vsyncpa [#allocation6], 1 }

</bundles_post_ra>
